<compile_context>
chip_gen: v7x
topology: tpu7x:2x2x1
jax: 0.10.0
libtpu: 0.0.40
codegen_flags: <defaults>
</compile_context>

<pallas_src>
import functools

import jax
import jax.numpy as jnp
from jax.experimental import pallas as pl
from jax.experimental.pallas import tpu as pltpu


def _round_up(x, m):
    return ((x + m - 1) // m) * m


def _value_net_kernel(x_ref, w1_ref, b1_ref, w2_ref, b2_ref, w3_ref, b3_ref,
                      o_ref):
    """Fused 3-layer SAC value MLP for one (batch_tile, S) tile."""
    x = x_ref[...]  # bf16 (batch_tile, S)

    # layer 1 (MXU, f32 accumulate) + bias + ReLU
    h1 = jnp.dot(x, w1_ref[...], preferred_element_type=jnp.float32)
    h1 = jnp.maximum(h1 + b1_ref[...], 0.0)

    # layer 2 (MXU, bf16 inputs, f32 accumulate) + bias + ReLU
    h2 = jnp.dot(h1.astype(w2_ref.dtype), w2_ref[...],
                 preferred_element_type=jnp.float32)
    h2 = jnp.maximum(h2 + b2_ref[...], 0.0)

    # layer 3: output width is 1 -> VPU broadcast-multiply + XLU lane reduce
    # (avoids an N=1 MXU push that would waste the whole systolic array width).
    out = jnp.sum(h2 * w3_ref[...], axis=-1, keepdims=True) + b3_ref[0]
    o_ref[...] = out.astype(o_ref.dtype)


def _pick_batch_tile(batch):
    # Large tiles amortize per-step pipeline overhead; cap at ceil(B/2) rounded
    # to 8 so the grid keeps >=2 "parallel" steps for v7x's two TensorCores.
    half = _round_up(pl.cdiv(batch, 2), 8)
    return max(8, min(512, half))


@functools.partial(jax.jit, static_argnames=("batch_tile",))
def value_network_sac(state, params, *, batch_tile=None):
    """SAC value network forward pass via a single fused Pallas TPU kernel.

    state:  (B, state_dim) float32 (any B; padded internally)
    params: dict with w1 (S,H0), b1 (1,H0), w2 (H0,H1), b2 (1,H1),
            w3 (1,H1),  b3 (1,)
    returns (B, 1) float32
    """
    # bf16 for the MXU operands / HBM stream; biases and w3 stay f32.
    w1 = params["w1"].astype(jnp.bfloat16)
    b1 = params["b1"].astype(jnp.float32)
    w2 = params["w2"].astype(jnp.bfloat16)
    b2 = params["b2"].astype(jnp.float32)
    w3 = params["w3"].astype(jnp.float32)                 # (1, H1) lane row
    b3 = params["b3"].reshape(-1).astype(jnp.float32)     # (1,) SMEM scalar

    B, S = state.shape
    H0 = w1.shape[1]
    H1 = w2.shape[1]

    if batch_tile is None:
        batch_tile = _pick_batch_tile(B)
    batch_tile = max(8, _round_up(batch_tile, 8))

    # Pad batch to a tile multiple; padded rows are trimmed after the call.
    Bp = _round_up(B, batch_tile)
    x = state.astype(jnp.bfloat16)
    if Bp != B:
        x = jnp.pad(x, ((0, Bp - B), (0, 0)))

    grid = (Bp // batch_tile,)

    # Weights/biases are small -> full-block, same block every grid step.
    full = lambda shape: pl.BlockSpec(shape, lambda i: (0,) * len(shape))

    out = pl.pallas_call(
        _value_net_kernel,
        out_shape=jax.ShapeDtypeStruct((Bp, 1), jnp.float32),
        grid=grid,
        in_specs=[
            pl.BlockSpec((batch_tile, S), lambda i: (i, 0)),       # state tile
            full((S, H0)), full((1, H0)),                          # layer 1
            full((H0, H1)), full((1, H1)),                         # layer 2
            full((1, H1)),                                         # w3 row
            pl.BlockSpec(memory_space=pltpu.MemorySpace.SMEM),     # b3 scalar
        ],
        out_specs=pl.BlockSpec((batch_tile, 1), lambda i: (i, 0)),
        compiler_params=pltpu.CompilerParams(
            dimension_semantics=("parallel",)),
    )(x, w1, b1, w2, b2, w3, b3)

    return out[:B]


def init_params(key, state_dim, hidden_dim, init_w=0.003):
    """Deterministic init mirroring the PyTorch module's __init__.

    linear1/linear2: default nn.Linear init  U(-1/sqrt(fan_in), +1/sqrt(fan_in))
    linear3:         U(-init_w, +init_w)     (weights and bias)
    Weights are stored as (in_features, out_features); w3 as a (1, H1) row.
    """
    k = jax.random.split(key, 6)
    h0, h1 = hidden_dim

    def uni(key, shape, bound):
        return jax.random.uniform(key, shape, jnp.float32, -bound, bound)

    b1_bound = 1.0 / jnp.sqrt(state_dim)
    b2_bound = 1.0 / jnp.sqrt(h0)

    return {
        "w1": uni(k[0], (state_dim, h0), b1_bound),
        "b1": uni(k[1], (1, h0), b1_bound),
        "w2": uni(k[2], (h0, h1), b2_bound),
        "b2": uni(k[3], (1, h1), b2_bound),
        "w3": uni(k[4], (1, h1), init_w),
        "b3": uni(k[5], (1,), init_w),
    }


def _reference_forward(state, params):
    """Pure-JAX reference matching the kernel's bf16-input / f32-accum math."""
    x = state.astype(jnp.bfloat16)
    w1 = params["w1"].astype(jnp.bfloat16)
    w2 = params["w2"].astype(jnp.bfloat16)
    h1 = jnp.maximum(
        jnp.dot(x, w1, preferred_element_type=jnp.float32) + params["b1"], 0.0)
    h2 = jnp.maximum(
        jnp.dot(h1.astype(jnp.bfloat16), w2,
                preferred_element_type=jnp.float32) + params["b2"], 0.0)
    return jnp.sum(h2 * params["w3"], axis=-1, keepdims=True) + params["b3"]


if __name__ == "__main__":
    key = jax.random.PRNGKey(0)
    k_param, k_state = jax.random.split(key)

    batch = 20                 # not a multiple of 8 -> exercises batch padding
    state_dim = 16
    hidden_dim = (32, 32)

    params = init_params(k_param, state_dim, hidden_dim)
    state = jax.random.normal(k_state, (batch, state_dim), jnp.float32)

    out = value_network_sac(state, params)
    out = jax.block_until_ready(out)

    ref = _reference_forward(state, params)
    assert out.shape == (batch, 1), out.shape
    assert jnp.allclose(out, ref, atol=1e-3, rtol=1e-3), (out, ref)

    print("KERNEL_OK")
</pallas_src>

<mosaic_0001>
module attributes {stable_mosaic.version = 11 : i64} {
  func.func @_value_net_kernel(%arg0: i32, %arg1: memref<16x16xbf16, #tpu.memory_space<vmem>>, %arg2: memref<16x32xbf16, #tpu.memory_space<vmem>>, %arg3: memref<1x32xf32, #tpu.memory_space<vmem>>, %arg4: memref<32x32xbf16, #tpu.memory_space<vmem>>, %arg5: memref<1x32xf32, #tpu.memory_space<vmem>>, %arg6: memref<1x32xf32, #tpu.memory_space<vmem>>, %arg7: memref<1xf32, #tpu.memory_space<smem>>, %arg8: memref<16x1xf32, #tpu.memory_space<vmem>>) attributes {dimension_semantics = [#tpu.dimension_semantics<parallel>], iteration_bounds = array<i64: 2>, scalar_prefetch = 0 : i64, scratch_operands = 0 : i64, tpu.core_type = #tpu.core_type<tc>, window_params = [{transform_indices = @transform_0, window_bounds = array<i64: 16, 16>}, {pipeline_mode = #tpu.pipeline_mode<synchronous>, transform_indices = @transform_1, window_bounds = array<i64: 16, 32>}, {pipeline_mode = #tpu.pipeline_mode<synchronous>, transform_indices = @transform_2, window_bounds = array<i64: 1, 32>}, {pipeline_mode = #tpu.pipeline_mode<synchronous>, transform_indices = @transform_3, window_bounds = array<i64: 32, 32>}, {pipeline_mode = #tpu.pipeline_mode<synchronous>, transform_indices = @transform_4, window_bounds = array<i64: 1, 32>}, {pipeline_mode = #tpu.pipeline_mode<synchronous>, transform_indices = @transform_5, window_bounds = array<i64: 1, 32>}, {transform_indices = @transform_6, window_bounds = array<i64: 1>}, {transform_indices = @transform_7, window_bounds = array<i64: 16, 1>}]} {
    %c0 = arith.constant 0 : index
    %c0_0 = arith.constant 0 : index
    %0 = vector.load %arg1[%c0, %c0_0] : memref<16x16xbf16, #tpu.memory_space<vmem>>, vector<16x16xbf16>
    %c0_1 = arith.constant 0 : index
    %c0_2 = arith.constant 0 : index
    %1 = vector.load %arg2[%c0_1, %c0_2] : memref<16x32xbf16, #tpu.memory_space<vmem>>, vector<16x32xbf16>
    %cst = arith.constant dense<0.000000e+00> : vector<16x32xf32>
    %2 = tpu.matmul %0, %1, %cst {dimension_numbers = #tpu.dot_dimension_numbers<[1], [0], [0], [1], [0, 0, 1, 1], [], []>} : vector<16x16xbf16>, vector<16x32xbf16>, vector<16x32xf32> -> vector<16x32xf32>
    %c0_3 = arith.constant 0 : index
    %c0_4 = arith.constant 0 : index
    %3 = vector.load %arg3[%c0_3, %c0_4] : memref<1x32xf32, #tpu.memory_space<vmem>>, vector<1x32xf32>
    %4 = vector.broadcast %3 : vector<1x32xf32> to vector<16x32xf32>
    %5 = arith.addf %2, %4 : vector<16x32xf32>
    %cst_5 = arith.constant 0.000000e+00 : f32
    %6 = vector.broadcast %cst_5 : f32 to vector<16x32xf32>
    %7 = arith.maximumf %5, %6 : vector<16x32xf32>
    %8 = arith.truncf %7 : vector<16x32xf32> to vector<16x32xbf16>
    %c0_6 = arith.constant 0 : index
    %c0_7 = arith.constant 0 : index
    %9 = vector.load %arg4[%c0_6, %c0_7] : memref<32x32xbf16, #tpu.memory_space<vmem>>, vector<32x32xbf16>
    %cst_8 = arith.constant dense<0.000000e+00> : vector<16x32xf32>
    %10 = tpu.matmul %8, %9, %cst_8 {dimension_numbers = #tpu.dot_dimension_numbers<[1], [0], [0], [1], [0, 0, 1, 1], [], []>} : vector<16x32xbf16>, vector<32x32xbf16>, vector<16x32xf32> -> vector<16x32xf32>
    %c0_9 = arith.constant 0 : index
    %c0_10 = arith.constant 0 : index
    %11 = vector.load %arg5[%c0_9, %c0_10] : memref<1x32xf32, #tpu.memory_space<vmem>>, vector<1x32xf32>
    %12 = vector.broadcast %11 : vector<1x32xf32> to vector<16x32xf32>
    %13 = arith.addf %10, %12 : vector<16x32xf32>
    %cst_11 = arith.constant 0.000000e+00 : f32
    %14 = vector.broadcast %cst_11 : f32 to vector<16x32xf32>
    %15 = arith.maximumf %13, %14 : vector<16x32xf32>
    %c0_12 = arith.constant 0 : index
    %c0_13 = arith.constant 0 : index
    %16 = vector.load %arg6[%c0_12, %c0_13] : memref<1x32xf32, #tpu.memory_space<vmem>>, vector<1x32xf32>
    %17 = vector.broadcast %16 : vector<1x32xf32> to vector<16x32xf32>
    %18 = arith.mulf %15, %17 : vector<16x32xf32>
    %cst_14 = arith.constant dense<0.000000e+00> : vector<16xf32>
    %19 = vector.multi_reduction <add>, %18, %cst_14 [1] : vector<16x32xf32> to vector<16xf32>
    %20 = vector.shape_cast %19 : vector<16xf32> to vector<16x1xf32>
    %c0_15 = arith.constant 0 : index
    %21 = memref.load %arg7[%c0_15] : memref<1xf32, #tpu.memory_space<smem>>
    %22 = vector.broadcast %21 : f32 to vector<16x1xf32>
    %23 = arith.addf %20, %22 : vector<16x1xf32>
    %c0_16 = arith.constant 0 : index
    %c0_17 = arith.constant 0 : index
    %24 = vector.load %arg8[%c0_16, %c0_17] : memref<16x1xf32, #tpu.memory_space<vmem>>, vector<16x1xf32>
    tpu.vector_store %arg8[%c0_16, %c0_17], %23 {strides = array<i32>} : memref<16x1xf32, #tpu.memory_space<vmem>>, vector<16x1xf32>,
    return
  }
  func.func @transform_0(%arg0: i32) -> (i32, i32) {
    %c0_i32 = arith.constant 0 : i32
    %c0_i32_0 = arith.constant 0 : i32
    return %arg0, %c0_i32 : i32, i32
  }
  func.func @transform_1(%arg0: i32) -> (i32, i32) {
    %c0_i32 = arith.constant 0 : i32
    %c0_i32_0 = arith.constant 0 : i32
    %c0_i32_1 = arith.constant 0 : i32
    return %c0_i32, %c0_i32_0 : i32, i32
  }
  func.func @transform_2(%arg0: i32) -> (i32, i32) {
    %c0_i32 = arith.constant 0 : i32
    %c0_i32_0 = arith.constant 0 : i32
    %c0_i32_1 = arith.constant 0 : i32
    return %c0_i32, %c0_i32_0 : i32, i32
  }
  func.func @transform_3(%arg0: i32) -> (i32, i32) {
    %c0_i32 = arith.constant 0 : i32
    %c0_i32_0 = arith.constant 0 : i32
    %c0_i32_1 = arith.constant 0 : i32
    return %c0_i32, %c0_i32_0 : i32, i32
  }
  func.func @transform_4(%arg0: i32) -> (i32, i32) {
    %c0_i32 = arith.constant 0 : i32
    %c0_i32_0 = arith.constant 0 : i32
    %c0_i32_1 = arith.constant 0 : i32
    return %c0_i32, %c0_i32_0 : i32, i32
  }
  func.func @transform_5(%arg0: i32) -> (i32, i32) {
    %c0_i32 = arith.constant 0 : i32
    %c0_i32_0 = arith.constant 0 : i32
    %c0_i32_1 = arith.constant 0 : i32
    return %c0_i32, %c0_i32_0 : i32, i32
  }
  func.func @transform_6(%arg0: i32) -> i32 {
    %c0_i32 = arith.constant 0 : i32
    %c0_i32_0 = arith.constant 0 : i32
    return %c0_i32 : i32
  }
  func.func @transform_7(%arg0: i32) -> (i32, i32) {
    %c0_i32 = arith.constant 0 : i32
    %c0_i32_0 = arith.constant 0 : i32
    return %arg0, %c0_i32 : i32, i32
  }
}

</mosaic_0001>

<bundles_post_ra>
// kernel: value_network_sac.1
= control target key start
LH: loop header
LB: loop body
LE: loop exit
PB: predicated region body
PF: predicated region fallthrough
CT: control target
= control target key end

     0   :  { %s608_s26 = smov 0   ;;  %s650_s0 = inlined_call_operand.vmem [shape: bf16[32,16], index: 0, kind: input, shape index: {}]   ;;  %s651_s1 = inlined_call_operand.vmem [shape: bf16[16,32], index: 1, kind: input, shape index: {}]   ;;  %s652_s2 = inlined_call_operand.vmem [shape: f32[1,32], index: 2, kind: input, shape index: {}]   ;;  %s653_s3 = inlined_call_operand.vmem [shape: bf16[32,32], index: 3, kind: input, shape index: {}]   ;;  %s654_s4 = inlined_call_operand.vmem [shape: f32[1,32], index: 4, kind: input, shape index: {}]   ;;  %s655_s5 = inlined_call_operand.vmem [shape: f32[1,32], index: 5, kind: input, shape index: {}]   ;;  %s656_s6 = inlined_call_operand.<no memory space> [shape: f32[1], index: 6, kind: input, shape index: {}]   ;;  %s657_s7 = inlined_call_operand.vmem [shape: f32[32,1], index: 7, kind: output, shape index: {}]  }
   0x1   :  { %12 = sst [smem:[#allocation2]] %s656_s6 }
   0x2 LB: > { %s502_s27 = sadd.s32 4294967295, %s561_s26   ;;  %p506_p0 = scmp.ge.s32.totalorder %s561_s26, 1  ;;  %s561_s26 = sphi %s608_s26, %s18_s26  }
   0x3   : > { %p239_p1 = scmp.lt.s32.totalorder %s561_s26, 3 }
   0x5   : > { %p240_p2 = pnand %p506_p0, %p239_p1 }
   0x6   : > { %v551_v0 = vld [vmem:[%s651_s1] sm:$0xff] (!%p240_p2)   ;;  %v563_v1 = vmov (!%p240_p2), 0.0   ;;  %s507_s6 = sshll.u32 (!%p240_p2), %s502_s27, 1  ;;  %vm564_vm0 = vmmov (!%p240_p2), 0   ;;  %vm306_vm1 = vcmask (!%p240_p2), 130048   ;;  %v554_v4 = vld [vmem:[%s653_s3 + $0x8] sm:$0xff] (!%p240_p2)  }
   0x7   : > { %243 = sbr.rel (%p240_p2) target bundleno = 606 (0x25e), region = 48  ;;  %527 = vmatprep.subr.bf16.mxu0 (!%p240_p2), %v563_v1  ;;  %533 = vmatprep.subr.bf16.mxu1 (!%p240_p2), %v563_v1  ;;  %p272_p3 = scmp.lt.s32.totalorder (!%p240_p2), %s507_s6, 3  ;;  %v553_v3 = vld [vmem:[%s653_s3] sm:$0xff] (!%p240_p2)   ;;  %vm377_vm2 = vcmask (!%p240_p2), 261120   ;;  %vm443_vm3 = vcmask (!%p240_p2), 7168  }
   0x8   : > { %528 = vmatpush3.bf16.msra.mxu0 (!%p240_p2), %v551_v0  ;;  %529 = vmatprep.mubr.msk.bf16.mxu0 (!%p240_p2), %vm564_vm0, %v563_v1  ;;  %v511_v5 = vld [vmem:[%s652_s2] ss:$0 sm:$0xff] (!%p240_p2)  ;;  %s439_s21 = sld [smem:[#allocation2]] (!%p240_p2) }
   0x9   : > { %537 = vmatprep.mubr.msk.bf16.mxu1 (!%p240_p2), %vm564_vm0, %v563_v1  ;;  %534 = vmatpush3.bf16.msra.mxu1 (!%p240_p2), %v553_v3  ;;  %v515_v15 = vld [vmem:[%s654_s4] ss:$0 sm:$0xff] (!%p240_p2) }
   0xa   : > { %535 = vmatprep.subr.bf16.mxu1 (!%p240_p2), %v563_v1  ;;  %v519_v20 = vld [vmem:[%s655_s5] ss:$0 sm:$0xff] (!%p240_p2) }
   0xd   : > { %536 = vmatpush3.bf16.msra.mxu1 (!%p240_p2), %v554_v4 }
   0xe   : > { %s659_s6 = smov (!%p272_p3, %s507_s6), 3  ;;  %v440_v29 = vstv %s439_s21 }
   0xf   : > { %s508_s30 = sshll.u32 %s659_s6, 2  ;;  %s510_s22 = sshll.u32 %s659_s6, 3 }
  0x10   : > { %s275_s10 = scalar_lea.vmem %s650_s0, %s508_s30  ;;  %s281_s25 = scalar_lea.vmem %s657_s7, %s510_s22 }
  0x11   : > { %v552_v2 = vld [vmem:[%s275_s10] sm:$0xff]  }
  0x12   : > { %530 = vmatmul.mubr.msk.bf16.vlgmr.msra.gmra.mrb[0].mxu0 %vm306_vm1, %v552_v2 }
  0xe5   : > { %v344_v6 = vpop.f32.mrb[0].mxu0 }
  0xe6   : > { %v345_v7 = vadd.f32 %v511_v5, %v344_v6  ;;  %v531_v8 = vpop.f32.mrb[1].mxu0 }
  0xe7   : > { %v347_v9 = vpop.f32.mrb[2].mxu0 }
  0xe8   : > { %v348_v10 = vadd.f32 %v511_v5, %v347_v9  ;;  %v532_v11 = vpop.f32.mrb[3].mxu0  ;;  %v351_v12 = vmax.f32 %v345_v7, 0.0 }
  0xea   : > { %v352_v13 = vmax.f32 %v348_v10, 0.0 }
  0xec   : > { %v353_v14 = vpack.c.bf16 %v352_v13, %v351_v12 }
  0xee   : > { %538 = vmatmul.mubr.msk.bf16.vlgmr.msra.gmra.mrb[0].mxu1 %vm377_vm2, %v353_v14 }
 0x1c1   : > { %v415_v16 = vpop.f32.mrb[0].mxu1 }
 0x1c2   : > { %v416_v17 = vadd.f32 %v515_v15, %v415_v16  ;;  %v539_v18 = vpop.f32.mrb[1].mxu1 }
 0x1c3   : > { %v418_v19 = vpop.f32.mrb[2].mxu1 }
 0x1c4   : > { %v422_v21 = vmax.f32 %v416_v17, 0.0  ;;  %v419_v22 = vadd.f32 %v515_v15, %v418_v19  ;;  %v540_v23 = vpop.f32.mrb[3].mxu1 }
 0x1c6   : > { %v423_v24 = vmax.f32 %v419_v22, 0.0  ;;  %v431_v25 = vmul.f32 %v519_v20, %v422_v21 }
 0x1c8   : > { %v433_v26 = vsel %vm377_vm2, %v431_v25, 0.0  ;;  %v432_v27 = vmul.f32 %v519_v20, %v423_v24 }
 0x1c9   : > { %434 = vadd.xlane.f32.xlu0 %v433_v26 }
 0x1ca   : > { %v436_v28 = vsel %vm377_vm2, %v432_v27, 0.0 }
 0x1cd   : > { %437 = vadd.xlane.f32.xlu0 %v436_v28 }
 0x256   : > { %v435_v30 = vpop.xlane.xlu0 %434 }
 0x257   : > { %v441_v31 = vadd.f32 %v440_v29, %v435_v30 }
 0x259   : > { %444 = vst.msk [vmem:[%s281_s25] sm:$0xff] %vm443_vm3, %v441_v31 }
 0x25a   : > { %v438_v32 = vpop.xlane.xlu0 %437 }
 0x25b   : > { %v442_v33 = vadd.f32 %v440_v29, %v438_v32 }
 0x25d   : > { %445 = vst.msk [vmem:[%s281_s25 + $0x8] sm:$0xff] %vm443_vm3, %v442_v33 }
 0x25e PF: > { %s18_s26 = sadd.s32 1, %s561_s26  }
 0x25f   : > { %p15_p4 = scmp.ge.s32.totalorder %s18_s26, 4  }
 0x261   :  { %17 = sbr.rel (!%p15_p4) target bundleno = 2 (0x2), region = 78 }

</bundles_post_ra>
